<compile_context>
chip_gen: v7x
topology: tpu7x:2x2x1
jax: 0.10.0
libtpu: 0.0.40
codegen_flags: <defaults>
</compile_context>

<pallas_src>
import jax
import jax.numpy as jnp
from jax import lax
from jax.experimental import pallas as pl
from jax.experimental.pallas import tpu as pltpu

DELTA = 2.0                  # self.delta in MyHuberLoss.__init__
_DELTA2 = DELTA * DELTA
_INV_D2 = 1.0 / _DELTA2
_ROWS = 8                    # q0..q4, q, label, pad  (sublane axis)
_NSTATS = 5                  # S_x, S_xx, S_xy, H_plain, H_tanh
_LANE = 128
_TILE_MAX = 65536            # lanes per block: 2 MiB f32, 4 MiB double-buffered


def _cdiv(a, b):
    return -(-a // b)


def _round_up(a, b):
    return _cdiv(a, b) * b


def _huber_stats_kernel(slab_ref, stats_ref, sx, sxx, sxy, hp, ht):
    t = pl.program_id(0)

    @pl.when(t == 0)
    def _init():
        sx[...] = jnp.zeros_like(sx)
        sxx[...] = jnp.zeros_like(sxx)
        sxy[...] = jnp.zeros_like(sxy)
        hp[...] = jnp.zeros_like(hp)
        ht[...] = jnp.zeros_like(ht)

    x = slab_ref[...].astype(jnp.float32)      # (8, T): rows 0-5 preds, 6 label, 7 pad
    y = x[6:7, :]                              # (1, T) label row; broadcasts over rows

    # One-pass sufficient statistics. Zero-padded columns contribute exactly 0
    # to every accumulated quantity (including the huber terms, since
    # ph(0) == 0 and tanh(0) == 0).
    sx[...] += jnp.sum(x, axis=1, keepdims=True)           # (8, 1)
    sxx[...] += jnp.sum(x * x, axis=1, keepdims=True)
    sxy[...] += jnp.sum(x * y, axis=1, keepdims=True)

    diff = x - y
    ph = _DELTA2 * jnp.sqrt(1.0 + diff * diff * _INV_D2) - _DELTA2
    th = jnp.tanh(diff)
    hp[...] += jnp.sum(ph, axis=1, keepdims=True)           # plain pseudo-Huber
    ht[...] += jnp.sum(ph * (th * th), axis=1, keepdims=True)  # tanh^2-weighted

    @pl.when(t == pl.num_programs(0) - 1)
    def _finalize():
        stats_ref[:, 0:1] = sx[...]
        stats_ref[:, 1:2] = sxx[...]
        stats_ref[:, 2:3] = sxy[...]
        stats_ref[:, 3:4] = hp[...]
        stats_ref[:, 4:5] = ht[...]


def my_huber_loss(output, label, *, tile_max=_TILE_MAX):
    """output: (N, 6) predictions q0..q4,q ; label: (N, 1) targets -> scalar loss."""
    output = jnp.asarray(output)
    label = jnp.asarray(label)
    n = output.shape[0]
    assert output.shape == (n, 6)

    # Optional bf16 slab halves HBM traffic; all in-kernel math is f32.
    compute_dt = jnp.bfloat16 if output.dtype == jnp.bfloat16 else jnp.float32
    preds = output.astype(compute_dt)
    lab = label.reshape(n, 1).astype(compute_dt)

    # Pack into a single lane-dense (8, N) slab: one contiguous DMA stream.
    # TODO(synk): for large N, produce this (8, N) layout upstream to avoid the
    # extra read+write pack pass in the wrapper.
    slab = jnp.concatenate(
        [preds, lab, jnp.zeros((n, 1), compute_dt)], axis=1).T        # (8, n)

    # Tile sizing: lane-dense multiples of 128; pad batch with zero columns.
    tile = min(int(tile_max), _round_up(n, _LANE))
    tile = _round_up(tile, _LANE)
    tiles = _cdiv(n, tile)
    n_pad = tiles * tile
    slab = jnp.pad(slab, ((0, 0), (0, n_pad - n)))

    stats = pl.pallas_call(
        _huber_stats_kernel,
        out_shape=jax.ShapeDtypeStruct((_ROWS, _NSTATS), jnp.float32),
        grid_spec=pltpu.PrefetchScalarGridSpec(
            num_scalar_prefetch=0,
            grid=(tiles,),
            in_specs=[pl.BlockSpec((_ROWS, tile), lambda t: (0, t))],
            out_specs=pl.BlockSpec((_ROWS, _NSTATS), lambda t: (0, 0)),
            scratch_shapes=[pltpu.VMEM((_ROWS, 1), jnp.float32)] * _NSTATS,
        ),
        compiler_params=pltpu.CompilerParams(
            dimension_semantics=("arbitrary",)),
        cost_estimate=pl.CostEstimate(
            flops=20 * _ROWS * n_pad,
            transcendentals=2 * _ROWS * n_pad,
            bytes_accessed=int(slab.size) * slab.dtype.itemsize
            + _ROWS * _NSTATS * 4),
    )(slab)

    # ---- O(1) scalar epilogue: PLCC, weighted-Huber mean, penalty ----
    s_x = stats[:, 0]
    s_xx = stats[:, 1]
    s_xy = stats[:, 2]
    h_plain = stats[:, 3]
    h_tanh = stats[:, 4]
    inv_n = jnp.float32(1.0 / n)

    # rows 0-4: alpha = 0.2 * tanh(diff)^2 ; row 5: alpha = 1
    loss_old = (0.2 * jnp.sum(h_tanh[:5]) + h_plain[5]) * inv_n

    s_y = s_x[6]
    s_yy = s_xx[6]
    cov = s_xy[:6] - s_x[:6] * s_y * inv_n
    ssx = s_xx[:6] - s_x[:6] * s_x[:6] * inv_n
    ssy = s_yy - s_y * s_y * inv_n
    plcc = cov * lax.rsqrt(ssx * ssy)            # (6,) q0..q4, q vs label

    one_minus = 1.0 - plcc
    pen = jnp.sum(one_minus[:5] * one_minus[:5]) / jnp.sum(one_minus[:5])
    # NOTE: the PyTorch forward also prints the six PLCC values (host-side I/O).
    return loss_old + pen + one_minus[5]


def _reference(output, label):
    """Pure-JAX reference mirroring the PyTorch forward (sans prints)."""
    x = output.astype(jnp.float32)
    y = label.astype(jnp.float32)[:, 0]

    def pearson(a, b):
        va = a - jnp.mean(a)
        vb = b - jnp.mean(b)
        return jnp.sum(va * vb) / (jnp.sqrt(jnp.sum(va ** 2)) * jnp.sqrt(jnp.sum(vb ** 2)))

    plcc = [pearson(x[:, i], y) for i in range(6)]
    diff = x - y[:, None]
    ph = DELTA ** 2 * (jnp.sqrt(1.0 + (diff / DELTA) ** 2) - 1.0)
    alpha = jnp.concatenate([0.2 * jnp.tanh(diff[:, :5]) ** 2,
                             jnp.ones((x.shape[0], 1), jnp.float32)], axis=1)
    loss_old = jnp.mean(jnp.sum(ph * alpha, axis=1))
    num = sum((1.0 - p) ** 2 for p in plcc[:5])
    den = 5.0 - sum(plcc[:5])
    return loss_old + num / den + (1.0 - plcc[5])


if __name__ == "__main__":
    key = jax.random.PRNGKey(0)
    k1, k2 = jax.random.split(key)

    # Small shapes consistent with the module: N batch rows of [q0..q4, q] + label.
    N = 8
    output = jax.random.uniform(k1, (N, 6), jnp.float32, minval=0.0, maxval=5.0)
    label = jax.random.uniform(k2, (N, 1), jnp.float32, minval=0.0, maxval=5.0)

    loss = my_huber_loss(output, label)
    jax.block_until_ready(loss)
    ref = _reference(output, label)
    assert jnp.allclose(loss, ref, rtol=2e-4, atol=2e-5), (loss, ref)

    # Also exercise the multi-tile path (3 tiles + zero-column padding).
    k3, k4 = jax.random.split(k2)
    N2 = 300
    output2 = jax.random.uniform(k3, (N2, 6), jnp.float32, minval=0.0, maxval=5.0)
    label2 = jax.random.uniform(k4, (N2, 1), jnp.float32, minval=0.0, maxval=5.0)
    loss2 = my_huber_loss(output2, label2, tile_max=128)
    jax.block_until_ready(loss2)
    ref2 = _reference(output2, label2)
    assert jnp.allclose(loss2, ref2, rtol=2e-4, atol=2e-4), (loss2, ref2)

    print("KERNEL_OK")
</pallas_src>

<mosaic_0001>
module attributes {stable_mosaic.version = 11 : i64} {
  func.func @_huber_stats_kernel(%arg0: i32, %arg1: memref<8x128xf32, #tpu.memory_space<vmem>>, %arg2: memref<8x5xf32, #tpu.memory_space<vmem>>, %arg3: memref<8x1xf32, #tpu.memory_space<vmem>>, %arg4: memref<8x1xf32, #tpu.memory_space<vmem>>, %arg5: memref<8x1xf32, #tpu.memory_space<vmem>>, %arg6: memref<8x1xf32, #tpu.memory_space<vmem>>, %arg7: memref<8x1xf32, #tpu.memory_space<vmem>>) attributes {dimension_semantics = [#tpu.dimension_semantics<arbitrary>], iteration_bounds = array<i64: 1>, scalar_prefetch = 0 : i64, scratch_operands = 5 : i64, tpu.core_type = #tpu.core_type<tc>, window_params = [{transform_indices = @transform_0, window_bounds = array<i64: 8, 128>}, {pipeline_mode = #tpu.pipeline_mode<synchronous>, transform_indices = @transform_1, window_bounds = array<i64: 8, 5>}]} {
    %c0_i32 = arith.constant 0 : i32
    %0 = arith.cmpi eq, %arg0, %c0_i32 : i32
    %1 = arith.extui %0 : i1 to i32
    %c0_i32_0 = arith.constant 0 : i32
    %2 = arith.cmpi ne, %1, %c0_i32_0 : i32
    scf.if %2 {
      %cst_32 = arith.constant 0.000000e+00 : f32
      %51 = vector.broadcast %cst_32 : f32 to vector<8x1xf32>
      %c0_33 = arith.constant 0 : index
      %c0_34 = arith.constant 0 : index
      %52 = vector.load %arg3[%c0_33, %c0_34] : memref<8x1xf32, #tpu.memory_space<vmem>>, vector<8x1xf32>
      tpu.vector_store %arg3[%c0_33, %c0_34], %51 {strides = array<i32>} : memref<8x1xf32, #tpu.memory_space<vmem>>, vector<8x1xf32>,
      %cst_35 = arith.constant 0.000000e+00 : f32
      %53 = vector.broadcast %cst_35 : f32 to vector<8x1xf32>
      %c0_36 = arith.constant 0 : index
      %c0_37 = arith.constant 0 : index
      %54 = vector.load %arg4[%c0_36, %c0_37] : memref<8x1xf32, #tpu.memory_space<vmem>>, vector<8x1xf32>
      tpu.vector_store %arg4[%c0_36, %c0_37], %53 {strides = array<i32>} : memref<8x1xf32, #tpu.memory_space<vmem>>, vector<8x1xf32>,
      %cst_38 = arith.constant 0.000000e+00 : f32
      %55 = vector.broadcast %cst_38 : f32 to vector<8x1xf32>
      %c0_39 = arith.constant 0 : index
      %c0_40 = arith.constant 0 : index
      %56 = vector.load %arg5[%c0_39, %c0_40] : memref<8x1xf32, #tpu.memory_space<vmem>>, vector<8x1xf32>
      tpu.vector_store %arg5[%c0_39, %c0_40], %55 {strides = array<i32>} : memref<8x1xf32, #tpu.memory_space<vmem>>, vector<8x1xf32>,
      %cst_41 = arith.constant 0.000000e+00 : f32
      %57 = vector.broadcast %cst_41 : f32 to vector<8x1xf32>
      %c0_42 = arith.constant 0 : index
      %c0_43 = arith.constant 0 : index
      %58 = vector.load %arg6[%c0_42, %c0_43] : memref<8x1xf32, #tpu.memory_space<vmem>>, vector<8x1xf32>
      tpu.vector_store %arg6[%c0_42, %c0_43], %57 {strides = array<i32>} : memref<8x1xf32, #tpu.memory_space<vmem>>, vector<8x1xf32>,
      %cst_44 = arith.constant 0.000000e+00 : f32
      %59 = vector.broadcast %cst_44 : f32 to vector<8x1xf32>
      %c0_45 = arith.constant 0 : index
      %c0_46 = arith.constant 0 : index
      %60 = vector.load %arg7[%c0_45, %c0_46] : memref<8x1xf32, #tpu.memory_space<vmem>>, vector<8x1xf32>
      tpu.vector_store %arg7[%c0_45, %c0_46], %59 {strides = array<i32>} : memref<8x1xf32, #tpu.memory_space<vmem>>, vector<8x1xf32>,
    } else {
    }
    %c0 = arith.constant 0 : index
    %c0_1 = arith.constant 0 : index
    %3 = vector.load %arg1[%c0, %c0_1] : memref<8x128xf32, #tpu.memory_space<vmem>>, vector<8x128xf32>
    %4 = vector.extract_strided_slice %3 {offsets = [6, 0], sizes = [1, 128], strides = [1, 1]} : vector<8x128xf32> to vector<1x128xf32>
    %c0_2 = arith.constant 0 : index
    %c0_3 = arith.constant 0 : index
    %5 = vector.load %arg3[%c0_2, %c0_3] : memref<8x1xf32, #tpu.memory_space<vmem>>, vector<8x1xf32>
    %cst = arith.constant dense<0.000000e+00> : vector<8xf32>
    %6 = vector.multi_reduction <add>, %3, %cst [1] : vector<8x128xf32> to vector<8xf32>
    %7 = vector.shape_cast %6 : vector<8xf32> to vector<8x1xf32>
    %8 = arith.addf %5, %7 : vector<8x1xf32>
    %c0_4 = arith.constant 0 : index
    %c0_5 = arith.constant 0 : index
    %9 = vector.load %arg3[%c0_4, %c0_5] : memref<8x1xf32, #tpu.memory_space<vmem>>, vector<8x1xf32>
    tpu.vector_store %arg3[%c0_4, %c0_5], %8 {strides = array<i32>} : memref<8x1xf32, #tpu.memory_space<vmem>>, vector<8x1xf32>,
    %c0_6 = arith.constant 0 : index
    %c0_7 = arith.constant 0 : index
    %10 = vector.load %arg4[%c0_6, %c0_7] : memref<8x1xf32, #tpu.memory_space<vmem>>, vector<8x1xf32>
    %11 = arith.mulf %3, %3 : vector<8x128xf32>
    %cst_8 = arith.constant dense<0.000000e+00> : vector<8xf32>
    %12 = vector.multi_reduction <add>, %11, %cst_8 [1] : vector<8x128xf32> to vector<8xf32>
    %13 = vector.shape_cast %12 : vector<8xf32> to vector<8x1xf32>
    %14 = arith.addf %10, %13 : vector<8x1xf32>
    %c0_9 = arith.constant 0 : index
    %c0_10 = arith.constant 0 : index
    %15 = vector.load %arg4[%c0_9, %c0_10] : memref<8x1xf32, #tpu.memory_space<vmem>>, vector<8x1xf32>
    tpu.vector_store %arg4[%c0_9, %c0_10], %14 {strides = array<i32>} : memref<8x1xf32, #tpu.memory_space<vmem>>, vector<8x1xf32>,
    %c0_11 = arith.constant 0 : index
    %c0_12 = arith.constant 0 : index
    %16 = vector.load %arg5[%c0_11, %c0_12] : memref<8x1xf32, #tpu.memory_space<vmem>>, vector<8x1xf32>
    %17 = vector.broadcast %4 : vector<1x128xf32> to vector<8x128xf32>
    %18 = arith.mulf %3, %17 : vector<8x128xf32>
    %cst_13 = arith.constant dense<0.000000e+00> : vector<8xf32>
    %19 = vector.multi_reduction <add>, %18, %cst_13 [1] : vector<8x128xf32> to vector<8xf32>
    %20 = vector.shape_cast %19 : vector<8xf32> to vector<8x1xf32>
    %21 = arith.addf %16, %20 : vector<8x1xf32>
    %c0_14 = arith.constant 0 : index
    %c0_15 = arith.constant 0 : index
    %22 = vector.load %arg5[%c0_14, %c0_15] : memref<8x1xf32, #tpu.memory_space<vmem>>, vector<8x1xf32>
    tpu.vector_store %arg5[%c0_14, %c0_15], %21 {strides = array<i32>} : memref<8x1xf32, #tpu.memory_space<vmem>>, vector<8x1xf32>,
    %23 = vector.broadcast %4 : vector<1x128xf32> to vector<8x128xf32>
    %24 = arith.subf %3, %23 : vector<8x128xf32>
    %25 = arith.mulf %24, %24 : vector<8x128xf32>
    %cst_16 = arith.constant 2.500000e-01 : f32
    %26 = vector.broadcast %cst_16 : f32 to vector<8x128xf32>
    %27 = arith.mulf %25, %26 : vector<8x128xf32>
    %cst_17 = arith.constant 1.000000e+00 : f32
    %28 = vector.broadcast %cst_17 : f32 to vector<8x128xf32>
    %29 = arith.addf %28, %27 : vector<8x128xf32>
    %30 = math.sqrt %29 : vector<8x128xf32>
    %cst_18 = arith.constant 4.000000e+00 : f32
    %31 = vector.broadcast %cst_18 : f32 to vector<8x128xf32>
    %32 = arith.mulf %31, %30 : vector<8x128xf32>
    %cst_19 = arith.constant 4.000000e+00 : f32
    %33 = vector.broadcast %cst_19 : f32 to vector<8x128xf32>
    %34 = arith.subf %32, %33 : vector<8x128xf32>
    %35 = math.tanh %24 : vector<8x128xf32>
    %c0_20 = arith.constant 0 : index
    %c0_21 = arith.constant 0 : index
    %36 = vector.load %arg6[%c0_20, %c0_21] : memref<8x1xf32, #tpu.memory_space<vmem>>, vector<8x1xf32>
    %cst_22 = arith.constant dense<0.000000e+00> : vector<8xf32>
    %37 = vector.multi_reduction <add>, %34, %cst_22 [1] : vector<8x128xf32> to vector<8xf32>
    %38 = vector.shape_cast %37 : vector<8xf32> to vector<8x1xf32>
    %39 = arith.addf %36, %38 : vector<8x1xf32>
    %c0_23 = arith.constant 0 : index
    %c0_24 = arith.constant 0 : index
    %40 = vector.load %arg6[%c0_23, %c0_24] : memref<8x1xf32, #tpu.memory_space<vmem>>, vector<8x1xf32>
    tpu.vector_store %arg6[%c0_23, %c0_24], %39 {strides = array<i32>} : memref<8x1xf32, #tpu.memory_space<vmem>>, vector<8x1xf32>,
    %c0_25 = arith.constant 0 : index
    %c0_26 = arith.constant 0 : index
    %41 = vector.load %arg7[%c0_25, %c0_26] : memref<8x1xf32, #tpu.memory_space<vmem>>, vector<8x1xf32>
    %42 = arith.mulf %35, %35 : vector<8x128xf32>
    %43 = arith.mulf %34, %42 : vector<8x128xf32>
    %cst_27 = arith.constant dense<0.000000e+00> : vector<8xf32>
    %44 = vector.multi_reduction <add>, %43, %cst_27 [1] : vector<8x128xf32> to vector<8xf32>
    %45 = vector.shape_cast %44 : vector<8xf32> to vector<8x1xf32>
    %46 = arith.addf %41, %45 : vector<8x1xf32>
    %c0_28 = arith.constant 0 : index
    %c0_29 = arith.constant 0 : index
    %47 = vector.load %arg7[%c0_28, %c0_29] : memref<8x1xf32, #tpu.memory_space<vmem>>, vector<8x1xf32>
    tpu.vector_store %arg7[%c0_28, %c0_29], %46 {strides = array<i32>} : memref<8x1xf32, #tpu.memory_space<vmem>>, vector<8x1xf32>,
    %c0_i32_30 = arith.constant 0 : i32
    %48 = arith.cmpi eq, %arg0, %c0_i32_30 : i32
    %49 = arith.extui %48 : i1 to i32
    %c0_i32_31 = arith.constant 0 : i32
    %50 = arith.cmpi ne, %49, %c0_i32_31 : i32
    scf.if %50 {
      %c0_32 = arith.constant 0 : index
      %c0_33 = arith.constant 0 : index
      %51 = vector.load %arg3[%c0_32, %c0_33] : memref<8x1xf32, #tpu.memory_space<vmem>>, vector<8x1xf32>
      %c0_34 = arith.constant 0 : index
      %c0_35 = arith.constant 0 : index
      %52 = vector.load %arg2[%c0_34, %c0_35] : memref<8x5xf32, #tpu.memory_space<vmem>>, vector<8x1xf32>
      tpu.vector_store %arg2[%c0_34, %c0_35], %51 {strides = array<i32>} : memref<8x5xf32, #tpu.memory_space<vmem>>, vector<8x1xf32>,
      %c0_36 = arith.constant 0 : index
      %c0_37 = arith.constant 0 : index
      %53 = vector.load %arg4[%c0_36, %c0_37] : memref<8x1xf32, #tpu.memory_space<vmem>>, vector<8x1xf32>
      %c0_38 = arith.constant 0 : index
      %c1 = arith.constant 1 : index
      %54 = vector.load %arg2[%c0_38, %c1] : memref<8x5xf32, #tpu.memory_space<vmem>>, vector<8x1xf32>
      tpu.vector_store %arg2[%c0_38, %c1], %53 {strides = array<i32>} : memref<8x5xf32, #tpu.memory_space<vmem>>, vector<8x1xf32>,
      %c0_39 = arith.constant 0 : index
      %c0_40 = arith.constant 0 : index
      %55 = vector.load %arg5[%c0_39, %c0_40] : memref<8x1xf32, #tpu.memory_space<vmem>>, vector<8x1xf32>
      %c0_41 = arith.constant 0 : index
      %c2 = arith.constant 2 : index
      %56 = vector.load %arg2[%c0_41, %c2] : memref<8x5xf32, #tpu.memory_space<vmem>>, vector<8x1xf32>
      tpu.vector_store %arg2[%c0_41, %c2], %55 {strides = array<i32>} : memref<8x5xf32, #tpu.memory_space<vmem>>, vector<8x1xf32>,
      %c0_42 = arith.constant 0 : index
      %c0_43 = arith.constant 0 : index
      %57 = vector.load %arg6[%c0_42, %c0_43] : memref<8x1xf32, #tpu.memory_space<vmem>>, vector<8x1xf32>
      %c0_44 = arith.constant 0 : index
      %c3 = arith.constant 3 : index
      %58 = vector.load %arg2[%c0_44, %c3] : memref<8x5xf32, #tpu.memory_space<vmem>>, vector<8x1xf32>
      tpu.vector_store %arg2[%c0_44, %c3], %57 {strides = array<i32>} : memref<8x5xf32, #tpu.memory_space<vmem>>, vector<8x1xf32>,
      %c0_45 = arith.constant 0 : index
      %c0_46 = arith.constant 0 : index
      %59 = vector.load %arg7[%c0_45, %c0_46] : memref<8x1xf32, #tpu.memory_space<vmem>>, vector<8x1xf32>
      %c0_47 = arith.constant 0 : index
      %c4 = arith.constant 4 : index
      %60 = vector.load %arg2[%c0_47, %c4] : memref<8x5xf32, #tpu.memory_space<vmem>>, vector<8x1xf32>
      tpu.vector_store %arg2[%c0_47, %c4], %59 {strides = array<i32>} : memref<8x5xf32, #tpu.memory_space<vmem>>, vector<8x1xf32>,
    } else {
    }
    return
  }
  func.func @transform_0(%arg0: i32) -> (i32, i32) {
    %c0_i32 = arith.constant 0 : i32
    %c0_i32_0 = arith.constant 0 : i32
    return %c0_i32, %arg0 : i32, i32
  }
  func.func @transform_1(%arg0: i32) -> (i32, i32) {
    %c0_i32 = arith.constant 0 : i32
    %c0_i32_0 = arith.constant 0 : i32
    %c0_i32_1 = arith.constant 0 : i32
    return %c0_i32, %c0_i32_0 : i32, i32
  }
}

</mosaic_0001>

<bundles_post_ra>
// kernel: tpu_custom_call.1
= control target key start
LH: loop header
LB: loop body
LE: loop exit
PB: predicated region body
PF: predicated region fallthrough
CT: control target
= control target key end

     0   :  { %6 = vsyncpa [#allocation8], 0  ;;  %s240_s0 = inlined_call_operand.hbm [shape: f32[8,128], index: 0, kind: input, shape index: {}]   ;;  %s241_s1 = inlined_call_operand.hbm [shape: f32[8,5], index: 1, kind: output, shape index: {}]  }
   0x1   :  { %7 = vsyncpa [#allocation9], 0  ;;  %s188_s6 = smov [#allocation7]   ;;  %s140_s10 = scalar_lea.hbm %s240_s0, 128 }
   0x2   :  { %s14_s7 = sshll.u32 %s188_s6, 4  ;;  %p141_p0 = scmp.ne.s32.totalorder %s240_s0, %s140_s10  ;;  %s15_s7 = int_to_ptr.vmem [resolvable:$true] %s14_s7 }
   0x3   :  { %p144_p1 = scmp.lt.u32.totalorder %s140_s10, %s240_s0 }
   0x5   :  { %p146_p2 = pnand %p144_p1, %p141_p0 }
   0x7   :  { %149 = shalt.err (!%p146_p2)
}
   0x8   :  { %s150_s15 = scalar_lea.vmem %s15_s7, 128  ;;  %p155_p4 = scmp.lt.s32.totalorder %s15_s7, %s15_s7 }
   0x9   :  { %p151_p3 = scmp.ne.s32.totalorder %s15_s7, %s150_s15  ;;  %p156_p5 = scmp.lt.s32.totalorder %s150_s15, %s150_s15 }
   0xb   :  { %p157_p6 = por %p156_p5, %p155_p4 }
   0xd   :  { %p158_p7 = pnand %p157_p6, %p151_p3 }
   0xf   :  { %161 = shalt.err (!%p158_p7)
}
  0x10   :  { %17 = dma.hbm_to_vmem [thread:$0]  %s240_s0, 128, %s15_s7, [#allocation8]  }
  0x11   :  { %184 = dma.done.wait [#allocation8], 128  }
  0x12   :  { %185 = vsyncadd [#allocation8], 4294967168  ;;  %v45_v0 = vlaneseq  ;;  %vm25_vm0 = vcmask 7168   ;;  %v189_v1 = vmov 0.0   ;;  %v31_v4 = vld [vmem:[#allocation7] sm:$0xff]  ;;  %s190_s0 = smov 1  }
  0x13   :  { %27 = vst.msk [vmem:[#allocation3] sm:$0xff] %vm25_vm0, %v189_v1  ;;  %26 = vst.msk [vmem:[#allocation2] sm:$0xff] %vm25_vm0, %v189_v1  ;;  %v39_v5 = vmul.f32 %v31_v4, %v31_v4  ;;  %s191_s18 = smov 2   ;;  %s192_s19 = smov 3   ;;  %vm90_vm3 = vcmask 15368   ;;  %vm97_vm4 = vcmask 23568  }
  0x14   :  { %28 = vst.msk [vmem:[#allocation4] sm:$0xff] %vm25_vm0, %v189_v1  ;;  %29 = vst.msk [vmem:[#allocation5] sm:$0xff] %vm25_vm0, %v189_v1  ;;  %v46_v2 = vshrl.u32 %v45_v0, 7  ;;  %s193_s20 = smov 4   ;;  %vm104_vm5 = vcmask 31768   ;;  %s194_s21 = smov [#allocation10]  }
  0x15   :  { %30 = vst.msk [vmem:[#allocation6] sm:$0xff] %vm25_vm0, %v189_v1  ;;  %40 = vadd.xlane.f32.xlu0 %v39_v5  ;;  %s119_s22 = sshll.u32 %s194_s21, 4  ;;  %vm111_vm6 = vcmask 39968   ;;  %s120_s22 = int_to_ptr.vmem [resolvable:$true] %s119_s22 }
  0x16   :  { %v47_v3 = vsub.s32 6, %v46_v2  ;;  %s162_s23 = scalar_lea.vmem %s120_s22, 128  ;;  %p167_p9 = scmp.lt.s32.totalorder %s120_s22, %s120_s22 }
  0x17   :  { %p163_p8 = scmp.ne.s32.totalorder %s120_s22, %s162_s23  ;;  %p168_p10 = scmp.lt.s32.totalorder %s162_s23, %s162_s23 }
  0x18   :  { %v48_v6 = vrot.slane %v31_v4, %v47_v3 }
  0x19   :  { %p169_p11 = por %p168_p10, %p167_p9 }
  0x1a   :  { %v49_v7 = vmul.f32 %v48_v6, %v31_v4  ;;  %v54_v8 = vsub.f32 %v31_v4, %v48_v6  ;;  %v38_v22 = vld [vmem:[#allocation3] sm:$0xff]  ;;  %v32_v28 = vld [vmem:[#allocation2] sm:$0xff] }
  0x1b   :  { %v44_v25 = vld [vmem:[#allocation4] sm:$0xff]  ;;  %v68_v34 = vld [vmem:[#allocation5] sm:$0xff]  ;;  %p170_p12 = pnand %p169_p11, %p163_p8 }
  0x1c   :  { %v55_v9 = vmul.f32 %v54_v8, %v54_v8  ;;  %50 = vadd.xlane.f32.xlu0 %v49_v7  ;;  %v73_v37 = vld [vmem:[#allocation6] sm:$0xff] }
  0x1e   :  { %v56_v10 = vmul.f32 0.25, %v55_v9 }
  0x20   :  { %v57_v11 = vadd.f32 1.0, %v56_v10  ;;  %33 = vadd.xlane.f32.xlu0 %v31_v4 }
  0x22   :  { %136 = vrsqrt.f32 %v57_v11  ;;  %vm60_vm1 = vcmp.eq.f32.partialorder %v57_v11, inf  ;;  %v63_v13 = vand.u32 2147483648, %v57_v11  ;;  %vm62_vm2 = vcmp.eq.f32.partialorder %v57_v11, 0.0 }
  0x23   :  { %138 = vtanh.f32 %v54_v8 }
  0x2c   :  { %v137_v12 = vpop.eup %136 }
  0x2d   :  { %v59_v14 = vmul.f32 %v137_v12, %v57_v11  ;;  %v139_v15 = vpop.eup %138 }
  0x2e   :  { %v74_v19 = vmul.f32 %v139_v15, %v139_v15 }
  0x2f   :  { %v61_v16 = vsel %vm60_vm1, %v57_v11, %v59_v14 }
  0x30   :  { %v64_v17 = vsel %vm62_vm2, %v63_v13, %v61_v16 }
  0x31   :  { %v65_v18 = vmul.f32 4.0, %v64_v17 }
  0x33   :  { %v128_v20 = vadd.f32 -4.0, %v65_v18 }
  0x35   :  { %69 = vadd.xlane.f32.xlu1 %v128_v20  ;;  %v75_v21 = vmul.f32 %v128_v20, %v74_v19 }
  0x39   :  { %76 = vadd.xlane.f32.xlu1 %v75_v21 }
  0xa2   :  { %v41_v23 = vpop.xlane.xlu0 %40 }
  0xa3   :  { %v42_v24 = vadd.f32 %v41_v23, %v38_v22 }
  0xa5   :  { %43 = vst.msk [vmem:[#allocation3] sm:$0xff] %vm25_vm0, %v42_v24 }
  0xa9   :  { %v51_v26 = vpop.xlane.xlu0 %50 }
  0xaa   :  { %v52_v27 = vadd.f32 %v51_v26, %v44_v25 }
  0xac   :  { %53 = vst.msk [vmem:[#allocation4] sm:$0xff] %vm25_vm0, %v52_v27  ;;  %v85_v31 = vld [vmem:[#allocation3] sm:$0xff] }
  0xad   :  { %v34_v29 = vpop.xlane.xlu0 %33  ;;  %87 = vrot.lane.b32.xlu1 %v85_v31, %s190_s0 }
  0xae   :  { %v35_v30 = vadd.f32 %v34_v29, %v32_v28 }
  0xb0   :  { %37 = vst.msk [vmem:[#allocation2] sm:$0xff] %vm25_vm0, %v35_v30 }
  0xb3   :  { %v92_v32 = vld [vmem:[#allocation4] sm:$0xff] }
  0xb4   :  { %94 = vrot.lane.b32.xlu0 %v92_v32, %s191_s18 }
  0xb7   :  { %v83_v33 = vld [vmem:[#allocation2] sm:$0xff] }
  0xb8   :  { %84 = vst.msk [vmem:[#allocation10] sm:$0xff] %vm25_vm0, %v83_v33 }
  0xc2   :  { %v70_v35 = vpop.xlane.xlu1 %69 }
  0xc3   :  { %v71_v36 = vadd.f32 %v70_v35, %v68_v34 }
  0xc5   :  { %72 = vst.msk [vmem:[#allocation5] sm:$0xff] %vm25_vm0, %v71_v36 }
  0xc6   :  { %v77_v38 = vpop.xlane.xlu1 %76 }
  0xc7   :  { %v78_v39 = vadd.f32 %v77_v38, %v73_v37 }
  0xc9   :  { %79 = vst.msk [vmem:[#allocation6] sm:$0xff] %vm25_vm0, %v78_v39 }
  0xcc   :  { %v99_v40 = vld [vmem:[#allocation5] sm:$0xff] }
  0xcd   :  { %101 = vrot.lane.b32.xlu1 %v99_v40, %s192_s19 }
  0xd0   :  { %v106_v41 = vld [vmem:[#allocation6] sm:$0xff] }
  0xd1   :  { %108 = vrot.lane.b32.xlu1 %v106_v41, %s193_s20 }
 0x11f   :  { %v88_v42 = vpop.permute.xlu1 %87 }
 0x120   :  { %91 = vst.msk [vmem:[#allocation10] sm:$0xff] %vm90_vm3, %v88_v42 }
 0x126   :  { %v95_v43 = vpop.permute.xlu0 %94 }
 0x127   :  { %98 = vst.msk [vmem:[#allocation10] sm:$0xff] %vm97_vm4, %v95_v43 }
 0x13f   :  { %v102_v44 = vpop.permute.xlu1 %101 }
 0x140   :  { %105 = vst.msk [vmem:[#allocation10] sm:$0xff] %vm104_vm5, %v102_v44 }
 0x143   :  { %v109_v45 = vpop.permute.xlu1 %108 }
 0x144   :  { %112 = vst.msk [vmem:[#allocation10] sm:$0xff] %vm111_vm6, %v109_v45 }
 0x145   :  { %173 = shalt.err (!%p170_p12)
}
 0x146   :  { %s174_s26 = scalar_lea.hbm %s241_s1, 128 }
 0x147   :  { %p175_p13 = scmp.ne.s32.totalorder %s241_s1, %s174_s26  ;;  %p178_p0 = scmp.lt.u32.totalorder %s174_s26, %s241_s1 }
 0x149   :  { %p180_p1 = pnand %p178_p0, %p175_p13 }
 0x14b   :  { %183 = shalt.err (!%p180_p1)
}
 0x14c   :  { %122 = dma.vmem_to_hbm [thread:$0]  %s120_s22, 128, %s241_s1, [#allocation9]  }
 0x14d   :  { %186 = dma.done.wait [#allocation9], 128  }
 0x14e   :  { %187 = vsyncadd [#allocation9], 4294967168 }
 0x14f   :  { %126 = vsyncpa [#allocation8], 1 }
 0x150   :  { %127 = vsyncpa [#allocation9], 1 }

</bundles_post_ra>
